<compile_context>
chip_gen: v5e
topology: v5e:2x2
jax: 0.10.0
libtpu: 0.0.40
codegen_flags: <defaults>
</compile_context>

<pallas_src>
import functools

import jax
import jax.numpy as jnp
from jax import lax
from jax.experimental import pallas as pl
from jax.experimental.pallas import tpu as pltpu

BN_EPS = 1e-5
KSIZE = 7
STRIDE = 2
PAD = 3
CIN = 3                          # ConvNet input channels
COUT = 64                        # ConvNet.in_channel
KCOL = KSIZE * KSIZE * CIN       # 147: packed contraction depth
ROW_TILE = 16                    # conv output rows per grid step (kernel 1)
VMEM_LIMIT = 32 * 1024 * 1024    # safe on v5e/v6e/v7x; working sets are << this


# ----------------------------------------------------------------------------
# Kernel 1: packed 7x7/s2 conv for one (image, row-tile) + BN partial sums.
#   lhs = (TR*OW, 147) bf16 im2col rows (lane-dense, built in the wrapper)
#   rhs = (147, 64)    bf16 reshaped weights
# Single accumulating MXU dot with f32 accumulation; per-tile sum and
# sum-of-squares for the train-mode batch statistics come from the f32 acc.
# TODO(synk): on v5e (128-deep MXU) split K=147 into two aligned chunks
# (84 + 63) instead of Mosaic's ragged 128 + 19; v6e/v7x take K=147 in one pass.
# ----------------------------------------------------------------------------
def _conv_stats_kernel(p_ref, w_ref, y_ref, s_ref, ss_ref, *, tr, ow):
    lhs = p_ref[0].reshape(tr * ow, KCOL)                       # (M, 147) bf16
    acc = jnp.dot(lhs, w_ref[...], preferred_element_type=jnp.float32)
    y_ref[...] = acc.reshape(1, tr, ow, COUT).astype(y_ref.dtype)
    s_ref[...] = jnp.sum(acc, axis=0, keepdims=True).reshape(1, 1, 1, COUT)
    ss_ref[...] = jnp.sum(acc * acc, axis=0, keepdims=True).reshape(1, 1, 1, COUT)


def _conv_bn_stats(patches, w_k, tr):
    n, ohp, ow, _ = patches.shape
    nt = ohp // tr
    kernel = functools.partial(_conv_stats_kernel, tr=tr, ow=ow)
    return pl.pallas_call(
        kernel,
        out_shape=(
            jax.ShapeDtypeStruct((n, ohp, ow, COUT), jnp.bfloat16),   # conv y
            jax.ShapeDtypeStruct((n, nt, 1, COUT), jnp.float32),      # sum
            jax.ShapeDtypeStruct((n, nt, 1, COUT), jnp.float32),      # sum sq
        ),
        grid=(n, nt),
        in_specs=[pl.BlockSpec((1, tr, ow, KCOL), lambda i, t: (i, t, 0, 0)),
                  pl.BlockSpec((KCOL, COUT), lambda i, t: (0, 0))],
        out_specs=(
            pl.BlockSpec((1, tr, ow, COUT), lambda i, t: (i, t, 0, 0)),
            pl.BlockSpec((1, 1, 1, COUT), lambda i, t: (i, t, 0, 0)),
            pl.BlockSpec((1, 1, 1, COUT), lambda i, t: (i, t, 0, 0)),
        ),
        compiler_params=pltpu.CompilerParams(
            dimension_semantics=("parallel", "parallel"),   # megacore on v7x
            vmem_limit_bytes=VMEM_LIMIT),
    )(patches, w_k)


# ----------------------------------------------------------------------------
# Kernel 2: fused BatchNorm (precomputed scale/shift) + ReLU + 7x7/s2 max pool.
# Separable (row-max over the leading axis, then column-max), stride-2 done
# in-kernel, windows clipped to the valid range (== -inf padding), pooled tile
# written with a single store.
# TODO(synk): tile kernel 2 along pooled rows (haloed input block) for inputs
# beyond ~256x256 to cap the per-step VMEM working set on v7x.
# ----------------------------------------------------------------------------
def _bn_relu_pool_kernel(y_ref, scale_ref, shift_ref, o_ref,
                         *, oh, ow, poh, pow_):
    z = jnp.maximum(y_ref[0].astype(jnp.float32) * scale_ref[...]
                    + shift_ref[...], 0.0)              # (ohp, ow, 64) f32
    rows = []
    for po in range(poh):                               # H direction, stride 2
        lo = max(0, STRIDE * po - PAD)
        hi = min(oh, STRIDE * po + PAD + 1)             # clip to REAL oh
        rows.append(jnp.max(z[lo:hi], axis=0))          # leading-axis VPU max
    hm = jnp.stack(rows, axis=0)                        # (poh, ow, 64)
    cols = []
    for pw in range(pow_):                              # W direction, stride 2
        lo = max(0, STRIDE * pw - PAD)
        hi = min(ow, STRIDE * pw + PAD + 1)
        cols.append(jnp.max(hm[:, lo:hi, :], axis=1))   # (poh, 64)
    o_ref[...] = jnp.stack(cols, axis=0).reshape(1, pow_, poh, COUT)


def _bn_relu_pool(y, scale, shift, oh, poh, pow_):
    n, ohp, ow, _ = y.shape
    kernel = functools.partial(_bn_relu_pool_kernel, oh=oh, ow=ow,
                               poh=poh, pow_=pow_)
    return pl.pallas_call(
        kernel,
        out_shape=jax.ShapeDtypeStruct((n, pow_, poh, COUT), jnp.float32),
        grid=(n,),
        in_specs=[pl.BlockSpec((1, ohp, ow, COUT), lambda i: (i, 0, 0, 0)),
                  pl.BlockSpec((1, COUT), lambda i: (0, 0)),
                  pl.BlockSpec((1, COUT), lambda i: (0, 0))],
        out_specs=pl.BlockSpec((1, pow_, poh, COUT), lambda i: (i, 0, 0, 0)),
        compiler_params=pltpu.CompilerParams(
            dimension_semantics=("parallel",),
            vmem_limit_bytes=VMEM_LIMIT),
    )(y, scale, shift)


# ----------------------------------------------------------------------------
# Wrapper glue (pure layout: pad, NCHW->NHWC, im2col, O(C) BN finalize,
# final transpose back to NCHW).
# ----------------------------------------------------------------------------
def _im2col(x):
    """(N, 3, H, W) f32 -> (N, OH, OW, 147) bf16 patches, (kh, kw, cin) order."""
    n, cin, h, w = x.shape
    oh = (h + 2 * PAD - KSIZE) // STRIDE + 1
    ow = (w + 2 * PAD - KSIZE) // STRIDE + 1
    xp = jnp.pad(x, ((0, 0), (0, 0), (PAD, PAD), (PAD, PAD))).transpose(0, 2, 3, 1)
    cols = []
    for kh in range(KSIZE):
        for kw in range(KSIZE):
            cols.append(lax.slice(
                xp, (0, kh, kw, 0),
                (n, kh + STRIDE * (oh - 1) + 1, kw + STRIDE * (ow - 1) + 1, cin),
                (1, STRIDE, STRIDE, 1)))                 # (n, oh, ow, cin)
    patches = jnp.concatenate(cols, axis=-1)             # (n, oh, ow, 147)
    return patches.astype(jnp.bfloat16), oh, ow


@jax.jit
def convnet_forward(x, conv_w, gamma, beta):
    n = x.shape[0]
    patches, oh, ow = _im2col(x)

    # Pad OH to a multiple of the row tile (zero patches -> conv output 0,
    # contributes 0 to the batch-stat sums, never touched by the pool).
    tr = min(ROW_TILE, oh)
    ohp = ((oh + tr - 1) // tr) * tr
    if ohp != oh:
        patches = jnp.pad(patches, ((0, 0), (0, ohp - oh), (0, 0), (0, 0)))

    # weights -> (147, 64) bf16 in the same (kh, kw, cin) packing order.
    w_k = conv_w.transpose(2, 3, 1, 0).reshape(KCOL, COUT).astype(jnp.bfloat16)

    y, s, ss = _conv_bn_stats(patches, w_k, tr)

    # Finalize train-mode BatchNorm batch statistics (biased variance), O(C).
    # TODO(synk): E[x^2]-E[x]^2 can cancel for large-mean activations; switch
    # to a centered two-pass accumulation if used on real data at scale.
    m_total = n * oh * ow
    mean = jnp.sum(s, axis=(0, 1, 2)) / m_total
    var = jnp.maximum(jnp.sum(ss, axis=(0, 1, 2)) / m_total - mean * mean, 0.0)
    inv = lax.rsqrt(var + BN_EPS)
    scale = (gamma * inv).reshape(1, COUT).astype(jnp.float32)
    shift = (beta - mean * gamma * inv).reshape(1, COUT).astype(jnp.float32)

    poh = (oh + 2 * PAD - KSIZE) // STRIDE + 1
    pow_ = (ow + 2 * PAD - KSIZE) // STRIDE + 1
    pooled = _bn_relu_pool(y, scale, shift, oh, poh, pow_)  # (n, POW, POH, 64)
    return pooled.transpose(0, 3, 2, 1)                     # NCHW (n, 64, POH, POW)


# ----------------------------------------------------------------------------
# Pure-JAX f32 reference for verification.
# ----------------------------------------------------------------------------
def convnet_reference(x, conv_w, gamma, beta):
    conv = lax.conv_general_dilated(
        x, conv_w, window_strides=(STRIDE, STRIDE),
        padding=((PAD, PAD), (PAD, PAD)),
        dimension_numbers=("NCHW", "OIHW", "NCHW"))
    mean = jnp.mean(conv, axis=(0, 2, 3), keepdims=True)
    var = jnp.mean(jnp.square(conv - mean), axis=(0, 2, 3), keepdims=True)
    y = (conv - mean) * lax.rsqrt(var + BN_EPS)
    y = y * gamma.reshape(1, -1, 1, 1) + beta.reshape(1, -1, 1, 1)
    y = jnp.maximum(y, 0.0)
    return lax.reduce_window(
        y, -jnp.inf, lax.max,
        window_dimensions=(1, 1, KSIZE, KSIZE),
        window_strides=(1, 1, STRIDE, STRIDE),
        padding=((0, 0), (0, 0), (PAD, PAD), (PAD, PAD)))


if __name__ == "__main__":
    key = jax.random.PRNGKey(0)
    k_x, k_w, k_g, k_b = jax.random.split(key, 4)

    N, H, W = 2, 16, 16
    x = jax.random.normal(k_x, (N, CIN, H, W), dtype=jnp.float32)
    conv_w = jax.random.normal(k_w, (COUT, CIN, KSIZE, KSIZE),
                               dtype=jnp.float32) * 0.1
    gamma = 1.0 + 0.1 * jax.random.normal(k_g, (COUT,), dtype=jnp.float32)
    beta = 0.1 * jax.random.normal(k_b, (COUT,), dtype=jnp.float32)

    out = jax.block_until_ready(convnet_forward(x, conv_w, gamma, beta))
    ref = jax.block_until_ready(convnet_reference(x, conv_w, gamma, beta))

    assert out.shape == ref.shape == (N, COUT, 4, 4), (out.shape, ref.shape)
    # bf16 MXU operands / bf16 conv intermediate (f32 accumulation & BN stats)
    # -> relaxed tolerance vs the f32 reference.
    max_err = float(jnp.max(jnp.abs(out - ref)))
    assert max_err < 1e-1, f"mismatch vs reference, max abs err = {max_err}"

    print("KERNEL_OK")
</pallas_src>

<mosaic_0001>
module attributes {stable_mosaic.version = 11 : i64} {
  func.func @_conv_stats_kernel(%arg0: i32, %arg1: i32, %arg2: memref<1x8x8x147xbf16, #tpu.memory_space<vmem>>, %arg3: memref<147x64xbf16, #tpu.memory_space<vmem>>, %arg4: memref<1x8x8x64xbf16, #tpu.memory_space<vmem>>, %arg5: memref<1x1x1x64xf32, #tpu.memory_space<vmem>>, %arg6: memref<1x1x1x64xf32, #tpu.memory_space<vmem>>) attributes {dimension_semantics = [#tpu.dimension_semantics<parallel>, #tpu.dimension_semantics<parallel>], iteration_bounds = array<i64: 2, 1>, scalar_prefetch = 0 : i64, scratch_operands = 0 : i64, tpu.core_type = #tpu.core_type<tc>, window_params = [{transform_indices = @transform_0, window_bounds = array<i64: 1, 8, 8, 147>}, {pipeline_mode = #tpu.pipeline_mode<synchronous>, transform_indices = @transform_1, window_bounds = array<i64: 147, 64>}, {transform_indices = @transform_2, window_bounds = array<i64: 1, 8, 8, 64>}, {transform_indices = @transform_3, window_bounds = array<i64: 1, 1, 1, 64>}, {transform_indices = @transform_4, window_bounds = array<i64: 1, 1, 1, 64>}]} {
    %c0 = arith.constant 0 : index
    %c0_0 = arith.constant 0 : index
    %c0_1 = arith.constant 0 : index
    %c0_2 = arith.constant 0 : index
    %0 = vector.load %arg2[%c0, %c0_0, %c0_1, %c0_2] : memref<1x8x8x147xbf16, #tpu.memory_space<vmem>>, vector<1x8x8x147xbf16>
    %1 = vector.shape_cast %0 : vector<1x8x8x147xbf16> to vector<8x8x147xbf16>
    %2 = vector.shape_cast %1 : vector<8x8x147xbf16> to vector<64x147xbf16>
    %c0_3 = arith.constant 0 : index
    %c0_4 = arith.constant 0 : index
    %3 = vector.load %arg3[%c0_3, %c0_4] : memref<147x64xbf16, #tpu.memory_space<vmem>>, vector<147x64xbf16>
    %cst = arith.constant dense<0.000000e+00> : vector<64x64xf32>
    %4 = tpu.matmul %2, %3, %cst {dimension_numbers = #tpu.dot_dimension_numbers<[1], [0], [0], [1], [0, 0, 1, 1], [], []>} : vector<64x147xbf16>, vector<147x64xbf16>, vector<64x64xf32> -> vector<64x64xf32>
    %5 = vector.shape_cast %4 : vector<64x64xf32> to vector<1x8x8x64xf32>
    %6 = arith.truncf %5 : vector<1x8x8x64xf32> to vector<1x8x8x64xbf16>
    %c0_5 = arith.constant 0 : index
    %c0_6 = arith.constant 0 : index
    %c0_7 = arith.constant 0 : index
    %c0_8 = arith.constant 0 : index
    %7 = vector.load %arg4[%c0_5, %c0_6, %c0_7, %c0_8] : memref<1x8x8x64xbf16, #tpu.memory_space<vmem>>, vector<1x8x8x64xbf16>
    tpu.vector_store %arg4[%c0_5, %c0_6, %c0_7, %c0_8], %6 {strides = array<i32>} : memref<1x8x8x64xbf16, #tpu.memory_space<vmem>>, vector<1x8x8x64xbf16>,
    %cst_9 = arith.constant dense<0.000000e+00> : vector<64xf32>
    %8 = vector.multi_reduction <add>, %4, %cst_9 [0] : vector<64x64xf32> to vector<64xf32>
    %9 = vector.shape_cast %8 : vector<64xf32> to vector<1x64xf32>
    %10 = vector.shape_cast %9 : vector<1x64xf32> to vector<1x1x1x64xf32>
    %c0_10 = arith.constant 0 : index
    %c0_11 = arith.constant 0 : index
    %c0_12 = arith.constant 0 : index
    %c0_13 = arith.constant 0 : index
    %11 = vector.load %arg5[%c0_10, %c0_11, %c0_12, %c0_13] : memref<1x1x1x64xf32, #tpu.memory_space<vmem>>, vector<1x1x1x64xf32>
    tpu.vector_store %arg5[%c0_10, %c0_11, %c0_12, %c0_13], %10 {strides = array<i32>} : memref<1x1x1x64xf32, #tpu.memory_space<vmem>>, vector<1x1x1x64xf32>,
    %12 = arith.mulf %4, %4 : vector<64x64xf32>
    %cst_14 = arith.constant dense<0.000000e+00> : vector<64xf32>
    %13 = vector.multi_reduction <add>, %12, %cst_14 [0] : vector<64x64xf32> to vector<64xf32>
    %14 = vector.shape_cast %13 : vector<64xf32> to vector<1x64xf32>
    %15 = vector.shape_cast %14 : vector<1x64xf32> to vector<1x1x1x64xf32>
    %c0_15 = arith.constant 0 : index
    %c0_16 = arith.constant 0 : index
    %c0_17 = arith.constant 0 : index
    %c0_18 = arith.constant 0 : index
    %16 = vector.load %arg6[%c0_15, %c0_16, %c0_17, %c0_18] : memref<1x1x1x64xf32, #tpu.memory_space<vmem>>, vector<1x1x1x64xf32>
    tpu.vector_store %arg6[%c0_15, %c0_16, %c0_17, %c0_18], %15 {strides = array<i32>} : memref<1x1x1x64xf32, #tpu.memory_space<vmem>>, vector<1x1x1x64xf32>,
    return
  }
  func.func @transform_0(%arg0: i32, %arg1: i32) -> (i32, i32, i32, i32) {
    %c0_i32 = arith.constant 0 : i32
    %c0_i32_0 = arith.constant 0 : i32
    %c0_i32_1 = arith.constant 0 : i32
    return %arg0, %arg1, %c0_i32, %c0_i32_0 : i32, i32, i32, i32
  }
  func.func @transform_1(%arg0: i32, %arg1: i32) -> (i32, i32) {
    %c0_i32 = arith.constant 0 : i32
    %c0_i32_0 = arith.constant 0 : i32
    %c0_i32_1 = arith.constant 0 : i32
    return %c0_i32, %c0_i32_0 : i32, i32
  }
  func.func @transform_2(%arg0: i32, %arg1: i32) -> (i32, i32, i32, i32) {
    %c0_i32 = arith.constant 0 : i32
    %c0_i32_0 = arith.constant 0 : i32
    %c0_i32_1 = arith.constant 0 : i32
    return %arg0, %arg1, %c0_i32, %c0_i32_0 : i32, i32, i32, i32
  }
  func.func @transform_3(%arg0: i32, %arg1: i32) -> (i32, i32, i32, i32) {
    %c0_i32 = arith.constant 0 : i32
    %c0_i32_0 = arith.constant 0 : i32
    %c0_i32_1 = arith.constant 0 : i32
    return %arg0, %arg1, %c0_i32, %c0_i32_0 : i32, i32, i32, i32
  }
  func.func @transform_4(%arg0: i32, %arg1: i32) -> (i32, i32, i32, i32) {
    %c0_i32 = arith.constant 0 : i32
    %c0_i32_0 = arith.constant 0 : i32
    %c0_i32_1 = arith.constant 0 : i32
    return %arg0, %arg1, %c0_i32, %c0_i32_0 : i32, i32, i32, i32
  }
}

module attributes {stable_mosaic.version = 11 : i64} {
  func.func @_bn_relu_pool_kernel(%arg0: i32, %arg1: memref<1x8x8x64xbf16, #tpu.memory_space<vmem>>, %arg2: memref<1x64xf32, #tpu.memory_space<vmem>>, %arg3: memref<1x64xf32, #tpu.memory_space<vmem>>, %arg4: memref<1x4x4x64xf32, #tpu.memory_space<vmem>>) attributes {dimension_semantics = [#tpu.dimension_semantics<parallel>], iteration_bounds = array<i64: 2>, scalar_prefetch = 0 : i64, scratch_operands = 0 : i64, tpu.core_type = #tpu.core_type<tc>, window_params = [{transform_indices = @transform_0, window_bounds = array<i64: 1, 8, 8, 64>}, {pipeline_mode = #tpu.pipeline_mode<synchronous>, transform_indices = @transform_1, window_bounds = array<i64: 1, 64>}, {pipeline_mode = #tpu.pipeline_mode<synchronous>, transform_indices = @transform_2, window_bounds = array<i64: 1, 64>}, {transform_indices = @transform_3, window_bounds = array<i64: 1, 4, 4, 64>}]} {
    %c0 = arith.constant 0 : index
    %c0_0 = arith.constant 0 : index
    %c0_1 = arith.constant 0 : index
    %c0_2 = arith.constant 0 : index
    %0 = vector.load %arg1[%c0, %c0_0, %c0_1, %c0_2] : memref<1x8x8x64xbf16, #tpu.memory_space<vmem>>, vector<1x8x8x64xbf16>
    %1 = vector.shape_cast %0 : vector<1x8x8x64xbf16> to vector<8x8x64xbf16>
    %2 = arith.extf %1 : vector<8x8x64xbf16> to vector<8x8x64xf32>
    %c0_3 = arith.constant 0 : index
    %c0_4 = arith.constant 0 : index
    %3 = vector.load %arg2[%c0_3, %c0_4] : memref<1x64xf32, #tpu.memory_space<vmem>>, vector<1x64xf32>
    %4 = vector.shape_cast %3 : vector<1x64xf32> to vector<1x1x64xf32>
    %5 = vector.broadcast %4 : vector<1x1x64xf32> to vector<8x8x64xf32>
    %6 = arith.mulf %2, %5 : vector<8x8x64xf32>
    %c0_5 = arith.constant 0 : index
    %c0_6 = arith.constant 0 : index
    %7 = vector.load %arg3[%c0_5, %c0_6] : memref<1x64xf32, #tpu.memory_space<vmem>>, vector<1x64xf32>
    %8 = vector.shape_cast %7 : vector<1x64xf32> to vector<1x1x64xf32>
    %9 = vector.broadcast %8 : vector<1x1x64xf32> to vector<8x8x64xf32>
    %10 = arith.addf %6, %9 : vector<8x8x64xf32>
    %cst = arith.constant 0.000000e+00 : f32
    %11 = vector.broadcast %cst : f32 to vector<8x8x64xf32>
    %12 = arith.maximumf %10, %11 : vector<8x8x64xf32>
    %13 = vector.extract_strided_slice %12 {offsets = [0, 0, 0], sizes = [4, 8, 64], strides = [1, 1, 1]} : vector<8x8x64xf32> to vector<4x8x64xf32>
    %cst_7 = arith.constant dense<0xFF800000> : vector<8x64xf32>
    %14 = vector.multi_reduction <maximumf>, %13, %cst_7 [0] : vector<4x8x64xf32> to vector<8x64xf32>
    %15 = vector.extract_strided_slice %12 {offsets = [0, 0, 0], sizes = [6, 8, 64], strides = [1, 1, 1]} : vector<8x8x64xf32> to vector<6x8x64xf32>
    %cst_8 = arith.constant dense<0xFF800000> : vector<8x64xf32>
    %16 = vector.multi_reduction <maximumf>, %15, %cst_8 [0] : vector<6x8x64xf32> to vector<8x64xf32>
    %17 = vector.extract_strided_slice %12 {offsets = [1, 0, 0], sizes = [7, 8, 64], strides = [1, 1, 1]} : vector<8x8x64xf32> to vector<7x8x64xf32>
    %cst_9 = arith.constant dense<0xFF800000> : vector<8x64xf32>
    %18 = vector.multi_reduction <maximumf>, %17, %cst_9 [0] : vector<7x8x64xf32> to vector<8x64xf32>
    %19 = vector.extract_strided_slice %12 {offsets = [3, 0, 0], sizes = [5, 8, 64], strides = [1, 1, 1]} : vector<8x8x64xf32> to vector<5x8x64xf32>
    %cst_10 = arith.constant dense<0xFF800000> : vector<8x64xf32>
    %20 = vector.multi_reduction <maximumf>, %19, %cst_10 [0] : vector<5x8x64xf32> to vector<8x64xf32>
    %21 = vector.shape_cast %14 : vector<8x64xf32> to vector<1x8x64xf32>
    %22 = vector.shape_cast %16 : vector<8x64xf32> to vector<1x8x64xf32>
    %23 = vector.shape_cast %18 : vector<8x64xf32> to vector<1x8x64xf32>
    %24 = vector.shape_cast %20 : vector<8x64xf32> to vector<1x8x64xf32>
    %25 = tpu.concatenate %21, %22, %23, %24 in 0 : vector<1x8x64xf32>, vector<1x8x64xf32>, vector<1x8x64xf32>, vector<1x8x64xf32> -> vector<4x8x64xf32>
    %26 = vector.extract_strided_slice %25 {offsets = [0, 0, 0], sizes = [4, 4, 64], strides = [1, 1, 1]} : vector<4x8x64xf32> to vector<4x4x64xf32>
    %cst_11 = arith.constant dense<0xFF800000> : vector<4x64xf32>
    %27 = vector.multi_reduction <maximumf>, %26, %cst_11 [1] : vector<4x4x64xf32> to vector<4x64xf32>
    %28 = vector.extract_strided_slice %25 {offsets = [0, 0, 0], sizes = [4, 6, 64], strides = [1, 1, 1]} : vector<4x8x64xf32> to vector<4x6x64xf32>
    %cst_12 = arith.constant dense<0xFF800000> : vector<4x64xf32>
    %29 = vector.multi_reduction <maximumf>, %28, %cst_12 [1] : vector<4x6x64xf32> to vector<4x64xf32>
    %30 = vector.extract_strided_slice %25 {offsets = [0, 1, 0], sizes = [4, 7, 64], strides = [1, 1, 1]} : vector<4x8x64xf32> to vector<4x7x64xf32>
    %cst_13 = arith.constant dense<0xFF800000> : vector<4x64xf32>
    %31 = vector.multi_reduction <maximumf>, %30, %cst_13 [1] : vector<4x7x64xf32> to vector<4x64xf32>
    %32 = vector.extract_strided_slice %25 {offsets = [0, 3, 0], sizes = [4, 5, 64], strides = [1, 1, 1]} : vector<4x8x64xf32> to vector<4x5x64xf32>
    %cst_14 = arith.constant dense<0xFF800000> : vector<4x64xf32>
    %33 = vector.multi_reduction <maximumf>, %32, %cst_14 [1] : vector<4x5x64xf32> to vector<4x64xf32>
    %34 = vector.shape_cast %27 : vector<4x64xf32> to vector<1x4x64xf32>
    %35 = vector.shape_cast %29 : vector<4x64xf32> to vector<1x4x64xf32>
    %36 = vector.shape_cast %31 : vector<4x64xf32> to vector<1x4x64xf32>
    %37 = vector.shape_cast %33 : vector<4x64xf32> to vector<1x4x64xf32>
    %38 = tpu.concatenate %34, %35, %36, %37 in 0 : vector<1x4x64xf32>, vector<1x4x64xf32>, vector<1x4x64xf32>, vector<1x4x64xf32> -> vector<4x4x64xf32>
    %39 = vector.shape_cast %38 : vector<4x4x64xf32> to vector<1x4x4x64xf32>
    %c0_15 = arith.constant 0 : index
    %c0_16 = arith.constant 0 : index
    %c0_17 = arith.constant 0 : index
    %c0_18 = arith.constant 0 : index
    %40 = vector.load %arg4[%c0_15, %c0_16, %c0_17, %c0_18] : memref<1x4x4x64xf32, #tpu.memory_space<vmem>>, vector<1x4x4x64xf32>
    tpu.vector_store %arg4[%c0_15, %c0_16, %c0_17, %c0_18], %39 {strides = array<i32>} : memref<1x4x4x64xf32, #tpu.memory_space<vmem>>, vector<1x4x4x64xf32>,
    return
  }
  func.func @transform_0(%arg0: i32) -> (i32, i32, i32, i32) {
    %c0_i32 = arith.constant 0 : i32
    %c0_i32_0 = arith.constant 0 : i32
    %c0_i32_1 = arith.constant 0 : i32
    %c0_i32_2 = arith.constant 0 : i32
    return %arg0, %c0_i32, %c0_i32_0, %c0_i32_1 : i32, i32, i32, i32
  }
  func.func @transform_1(%arg0: i32) -> (i32, i32) {
    %c0_i32 = arith.constant 0 : i32
    %c0_i32_0 = arith.constant 0 : i32
    %c0_i32_1 = arith.constant 0 : i32
    return %c0_i32, %c0_i32_0 : i32, i32
  }
  func.func @transform_2(%arg0: i32) -> (i32, i32) {
    %c0_i32 = arith.constant 0 : i32
    %c0_i32_0 = arith.constant 0 : i32
    %c0_i32_1 = arith.constant 0 : i32
    return %c0_i32, %c0_i32_0 : i32, i32
  }
  func.func @transform_3(%arg0: i32) -> (i32, i32, i32, i32) {
    %c0_i32 = arith.constant 0 : i32
    %c0_i32_0 = arith.constant 0 : i32
    %c0_i32_1 = arith.constant 0 : i32
    %c0_i32_2 = arith.constant 0 : i32
    return %arg0, %c0_i32, %c0_i32_0, %c0_i32_1 : i32, i32, i32, i32
  }
}

</mosaic_0001>

<bundles_post_ra>
// kernel: convnet_forward.3
= control target key start
LH: loop header
LB: loop body
LE: loop exit
PB: predicated region body
PF: predicated region fallthrough
CT: control target
= control target key end

     0   :  { %s534_s12 = smov 0   ;;  %s631_s0 = inlined_call_operand.vmem [shape: bf16[2,8,8,64], index: 0, kind: input, shape index: {}]   ;;  %s632_s1 = inlined_call_operand.vmem [shape: f32[1,64], index: 1, kind: input, shape index: {}]   ;;  %s633_s2 = inlined_call_operand.vmem [shape: f32[1,64], index: 2, kind: input, shape index: {}]   ;;  %s634_s3 = inlined_call_operand.vmem [shape: f32[2,4,4,64], index: 3, kind: output, shape index: {}]  }
   0x1 LB: > { %s464_s13 = sadd.s32 4294967295, %s512_s12   ;;  %p468_p0 = scmp.ge.s32.totalorder %s512_s12, 1  ;;  %s512_s12 = sphi %s534_s12, %s13_s12  }
   0x2   : > { %p137_p1 = scmp.lt.s32.totalorder %s512_s12, 3 }
   0x4   : > { %p138_p2 = pnand %p468_p0, %p137_p1 }
   0x5   : > { %p161_p3 = scmp.lt.s32.totalorder (!%p138_p2), %s464_s13, 1 }
   0x6   : > { %141 = sbr.rel (%p138_p2) target bundleno = 70 (0x46), region = 32 }
   0xb   : > { %s636_s13 = smov (!%p161_p3, %s464_s13), 1  ;;  %v504_v0 = vld [vmem:[%s632_s1] ss:$0 sm:$0xff]  ;;  %vm219_vm0 = vcmask 523264   ;;  %vm242_vm1 = vcmask 519168   ;;  %vm271_vm2 = vcmask 521216  }
   0xc   : > { %s475_s14 = sshll.u32 %s636_s13, 5  ;;  %v505_v9 = vld [vmem:[%s633_s2] ss:$0 sm:$0xff]  ;;  %vm300_vm3 = vcmask 523265   ;;  %vm375_vm4 = vcmask 1041409   ;;  %vm378_vm5 = vcmask 1042434  }
   0xd   : > { %s165_s17 = scalar_lea.vmem %s631_s0, %s475_s14  ;;  %vm381_vm6 = vcmask 1043459   ;;  %vm329_vm7 = vcmask 523267   ;;  %s476_s22 = sshll.u32 %s636_s13, 4 }
   0xe   : > { %v478_v1 = vld [vmem:[%s165_s17] sm:$0xff]   ;;  %v493_v2 = vld [vmem:[%s165_s17 + $0x8] sm:$0xff]   ;;  %v494_v3 = vld [vmem:[%s165_s17 + $0x10] sm:$0xff]   ;;  %s594_s25 = scalar_lea.vmem %s634_s3, %s476_s22 }
   0xf   : > { %v479_v4 = vunpack.c.l.bf16 %v478_v1  ;;  %v480_v5 = vunpack.c.h.bf16 %v478_v1  ;;  %v483_v6 = vunpack.c.l.bf16 %v493_v2  ;;  %v484_v7 = vunpack.c.h.bf16 %v493_v2  ;;  %v495_v8 = vld [vmem:[%s165_s17 + $0x18] sm:$0xff]  }
  0x10   : > { %v487_v10 = vunpack.c.l.bf16 %v494_v3  ;;  %v488_v11 = vunpack.c.h.bf16 %v494_v3  ;;  %v491_v12 = vunpack.c.l.bf16 %v495_v8  ;;  %v492_v13 = vunpack.c.h.bf16 %v495_v8 }
  0x11   : > { %v191_v14 = vmul.f32 %v504_v0, %v479_v4  ;;  %v192_v15 = vmul.f32 %v504_v0, %v480_v5  ;;  %v193_v16 = vmul.f32 %v504_v0, %v483_v6  ;;  %v194_v17 = vmul.f32 %v504_v0, %v484_v7 }
  0x12   : > { %v195_v18 = vmul.f32 %v504_v0, %v487_v10  ;;  %v196_v19 = vmul.f32 %v504_v0, %v488_v11  ;;  %v197_v20 = vmul.f32 %v504_v0, %v491_v12  ;;  %v198_v21 = vmul.f32 %v504_v0, %v492_v13 }
  0x13   : > { %v203_v22 = vadd.f32 %v505_v9, %v191_v14  ;;  %v204_v23 = vadd.f32 %v505_v9, %v192_v15  ;;  %v205_v24 = vadd.f32 %v505_v9, %v193_v16  ;;  %v206_v25 = vadd.f32 %v505_v9, %v194_v17 }
  0x14   : > { %v207_v26 = vadd.f32 %v505_v9, %v195_v18  ;;  %v208_v27 = vadd.f32 %v505_v9, %v196_v19  ;;  %v209_v28 = vadd.f32 %v505_v9, %v197_v20  ;;  %v210_v29 = vadd.f32 %v505_v9, %v198_v21 }
  0x15   : > { %v211_v30 = vmax.f32 %v203_v22, 0.0  ;;  %v212_v31 = vmax.f32 %v204_v23, 0.0  ;;  %v213_v32 = vmax.f32 %v205_v24, 0.0  ;;  %v214_v33 = vmax.f32 %v206_v25, 0.0 }
  0x16   : > { %v215_v34 = vmax.f32 %v207_v26, 0.0  ;;  %v216_v35 = vmax.f32 %v208_v27, 0.0  ;;  %v217_v36 = vmax.f32 %v209_v28, 0.0  ;;  %v218_v37 = vmax.f32 %v210_v29, 0.0 }
  0x17   : > { %v220_v38 = vsel %vm219_vm0, %v211_v30, -inf  ;;  %v221_v39 = vsel %vm219_vm0, %v212_v31, -inf  ;;  %v222_v40 = vsel %vm219_vm0, %v213_v32, -inf  ;;  %v223_v41 = vsel %vm219_vm0, %v214_v33, -inf }
  0x18   : > { %v224_v42 = vmax.f32 %v220_v38, %v221_v39  ;;  %v225_v43 = vmax.f32 %v222_v40, %v223_v41  ;;  %v227_v44 = vsel %vm219_vm0, %v215_v34, -inf  ;;  %v229_v45 = vsel %vm219_vm0, %v216_v35, -inf }
  0x19   : > { %v228_v46 = vmax.f32 %v220_v38, %v227_v44  ;;  %v230_v47 = vmax.f32 %v221_v39, %v229_v45  ;;  %v233_v48 = vsel %vm219_vm0, %v217_v36, -inf  ;;  %v235_v49 = vsel %vm219_vm0, %v218_v37, -inf }
  0x1a   : > { %v562_v50 = vmax.f32 %v224_v42, %v225_v43  ;;  %v234_v51 = vmax.f32 %v222_v40, %v233_v48  ;;  %v236_v52 = vmax.f32 %v223_v41, %v235_v49  ;;  %v240_v53 = vmax.f32 %v229_v45, %v233_v48 }
  0x1b   : > { %v231_v54 = vmax.f32 %v228_v46, %v230_v47 }
  0x1c   : > { %v237_v55 = vmax.f32 %v230_v47, %v234_v51  ;;  %v238_v56 = vmax.f32 %v236_v52, %v227_v44  ;;  %v243_v57 = vsel %vm242_vm1, %v562_v50, -inf  ;;  %v272_v58 = vsel %vm271_vm2, %v562_v50, -inf }
  0x1d   : > { %v568_v59 = vmax.f32 %v231_v54, %v225_v43  ;;  %v244_v60 = vrot.slane %v243_v57, 4  ;;  %v273_v61 = vrot.slane %v272_v58, 4  ;;  %v301_v62 = vsel %vm300_vm3, %v562_v50, -inf }
  0x1e   : > { %v572_v63 = vmax.f32 %v237_v55, %v238_v56  ;;  %v574_v0 = vmax.f32 %v238_v56, %v240_v53  ;;  %v302_v1 = vrot.slane %v301_v62, 4 }
  0x1f   : > { %v245_v2 = vmax.f32 %v243_v57, %v244_v60  ;;  %v250_v3 = vsel %vm242_vm1, %v568_v59, -inf  ;;  %v274_v4 = vmax.f32 %v272_v58, %v273_v61  ;;  %v279_v5 = vsel %vm271_vm2, %v568_v59, -inf }
  0x20   : > { %v251_v6 = vrot.slane %v250_v3, 4  ;;  %v257_v7 = vsel %vm242_vm1, %v572_v63, -inf  ;;  %v264_v8 = vsel %vm242_vm1, %v574_v0, -inf  ;;  %v280_v9 = vrot.slane %v279_v5, 4 }
  0x21   : > { %v246_v10 = vrot.slane %v245_v2, 2  ;;  %v258_v11 = vrot.slane %v257_v7, 4  ;;  %v265_v12 = vrot.slane %v264_v8, 4  ;;  %v275_v13 = vrot.slane %v274_v4, 2 }
  0x22   : > { %v252_v14 = vmax.f32 %v250_v3, %v251_v6  ;;  %v281_v15 = vmax.f32 %v279_v5, %v280_v9  ;;  %v286_v16 = vsel %vm271_vm2, %v572_v63, -inf  ;;  %v293_v17 = vsel %vm271_vm2, %v574_v0, -inf }
  0x23   : > { %v247_v18 = vmax.f32 %v245_v2, %v246_v10  ;;  %v259_v19 = vmax.f32 %v257_v7, %v258_v11  ;;  %v266_v20 = vmax.f32 %v264_v8, %v265_v12  ;;  %v276_v21 = vmax.f32 %v274_v4, %v275_v13 }
  0x24   : > { %v253_v22 = vrot.slane %v252_v14, 2  ;;  %v282_v23 = vrot.slane %v281_v15, 2  ;;  %v287_v24 = vrot.slane %v286_v16, 4  ;;  %v294_v25 = vrot.slane %v293_v17, 4 }
  0x25   : > { %v248_v26 = vrot.slane %v247_v18, 1  ;;  %v260_v27 = vrot.slane %v259_v19, 2  ;;  %v267_v28 = vrot.slane %v266_v20, 2  ;;  %v277_v29 = vrot.slane %v276_v21, 1 }
  0x26   : > { %v254_v30 = vmax.f32 %v252_v14, %v253_v22  ;;  %v283_v31 = vmax.f32 %v281_v15, %v282_v23  ;;  %v288_v32 = vmax.f32 %v286_v16, %v287_v24  ;;  %v295_v33 = vmax.f32 %v293_v17, %v294_v25 }
  0x27   : > { %v249_v34 = vmax.f32 %v247_v18, %v248_v26  ;;  %v261_v35 = vmax.f32 %v259_v19, %v260_v27  ;;  %v268_v36 = vmax.f32 %v266_v20, %v267_v28  ;;  %v278_v37 = vmax.f32 %v276_v21, %v277_v29 }
  0x28   : > { %v255_v38 = vrot.slane %v254_v30, 1  ;;  %v284_v39 = vrot.slane %v283_v31, 1  ;;  %v289_v40 = vrot.slane %v288_v32, 2  ;;  %v296_v41 = vrot.slane %v295_v33, 2 }
  0x29   : > { %v262_v42 = vrot.slane %v261_v35, 1  ;;  %v269_v43 = vrot.slane %v268_v36, 1  ;;  %v303_v44 = vmax.f32 %v301_v62, %v302_v1  ;;  %v308_v45 = vsel %vm300_vm3, %v568_v59, -inf }
  0x2a   : > { %v256_v46 = vmax.f32 %v254_v30, %v255_v38  ;;  %v285_v47 = vmax.f32 %v283_v31, %v284_v39  ;;  %v290_v48 = vmax.f32 %v288_v32, %v289_v40  ;;  %v297_v49 = vmax.f32 %v295_v33, %v296_v41 }
  0x2b   : > { %v263_v51 = vmax.f32 %v261_v35, %v262_v42  ;;  %v270_v52 = vmax.f32 %v268_v36, %v269_v43  ;;  %v304_v53 = vrot.slane %v303_v44, 2  ;;  %v309_v54 = vrot.slane %v308_v45, 4 }
  0x2c   : > { %v374_v55 = vrot.slane %v256_v46, 7  ;;  %v291_v56 = vrot.slane %v290_v48, 1  ;;  %v298_v57 = vrot.slane %v297_v49, 1  ;;  %v383_v58 = vrot.slane %v285_v47, 7 }
  0x2d   : > { %v377_v60 = vrot.slane %v263_v51, 6  ;;  %v380_v61 = vrot.slane %v270_v52, 5  ;;  %v305_v2 = vmax.f32 %v303_v44, %v304_v53  ;;  %v310_v62 = vmax.f32 %v308_v45, %v309_v54 }
  0x2e   : > { %v376_v1 = vsel %vm375_vm4, %v374_v55, %v249_v34  ;;  %v292_v3 = vmax.f32 %v290_v48, %v291_v56  ;;  %v299_v4 = vmax.f32 %v297_v49, %v298_v57  ;;  %v330_v5 = vsel %vm329_vm7, %v562_v50, -inf }
  0x2f   : > { %v379_v6 = vsel %vm378_vm5, %v377_v60, %v376_v1  ;;  %v384_v7 = vsel %vm375_vm4, %v383_v58, %v278_v37  ;;  %v311_v8 = vrot.slane %v310_v62, 2  ;;  %v315_v9 = vsel %vm300_vm3, %v572_v63, -inf }
  0x30   : > { %v382_v10 = vsel %vm381_vm6, %v380_v61, %v379_v6  ;;  %v385_v11 = vrot.slane %v292_v3, 6  ;;  %v387_v12 = vrot.slane %v299_v4, 5  ;;  %v316_v13 = vrot.slane %v315_v9, 4 }
  0x31   : > { %405 = vst.msk [vmem:[%s594_s25] sm:$0xf] %vm242_vm1, %v382_v10  ;;  %v306_v14 = vrot.slane %v305_v2, 1  ;;  %v312_v15 = vmax.f32 %v310_v62, %v311_v8  ;;  %v322_v50 = vsel %vm300_vm3, %v574_v0, -inf  ;;  %v331_v16 = vrot.slane %v330_v5, 4 }
  0x32   : > { %v386_v17 = vsel %vm378_vm5, %v385_v11, %v384_v7  ;;  %v317_v18 = vmax.f32 %v315_v9, %v316_v13  ;;  %v323_v19 = vrot.slane %v322_v50, 4  ;;  %v337_v20 = vsel %vm329_vm7, %v568_v59, -inf }
  0x33   : > { %v388_v21 = vsel %vm381_vm6, %v387_v12, %v386_v17  ;;  %v313_v22 = vrot.slane %v312_v15, 1  ;;  %v332_v23 = vmax.f32 %v330_v5, %v331_v16  ;;  %v338_v24 = vrot.slane %v337_v20, 4 }
  0x34   : > { %406 = vst.msk [vmem:[%s594_s25 + $0x4] sm:$0xf] %vm242_vm1, %v388_v21  ;;  %v318_v25 = vrot.slane %v317_v18, 2  ;;  %v324_v26 = vmax.f32 %v322_v50, %v323_v19  ;;  %v344_v27 = vsel %vm329_vm7, %v572_v63, -inf  ;;  %v351_v28 = vsel %vm329_vm7, %v574_v0, -inf }
  0x35   : > { %v314_v29 = vmax.f32 %v312_v15, %v313_v22  ;;  %v333_v30 = vrot.slane %v332_v23, 2  ;;  %v339_v31 = vmax.f32 %v337_v20, %v338_v24  ;;  %v345_v32 = vrot.slane %v344_v27, 4 }
  0x36   : > { %v307_v59 = vmax.f32 %v305_v2, %v306_v14  ;;  %v319_v33 = vmax.f32 %v317_v18, %v318_v25  ;;  %v325_v34 = vrot.slane %v324_v26, 2  ;;  %v352_v35 = vrot.slane %v351_v28, 4 }
  0x37   : > { %v389_v36 = vrot.slane %v314_v29, 7  ;;  %v334_v37 = vmax.f32 %v332_v23, %v333_v30  ;;  %v340_v38 = vrot.slane %v339_v31, 2  ;;  %v346_v39 = vmax.f32 %v344_v27, %v345_v32 }
  0x38   : > { %v320_v40 = vrot.slane %v319_v33, 1  ;;  %v326_v41 = vmax.f32 %v324_v26, %v325_v34  ;;  %v353_v42 = vmax.f32 %v351_v28, %v352_v35 }
  0x39   : > { %v335_v43 = vrot.slane %v334_v37, 1  ;;  %v341_v63 = vmax.f32 %v339_v31, %v340_v38  ;;  %v347_v44 = vrot.slane %v346_v39, 2  ;;  %v390_v47 = vsel %vm375_vm4, %v389_v36, %v307_v59 }
  0x3a   : > { %v321_v45 = vmax.f32 %v319_v33, %v320_v40  ;;  %v327_v0 = vrot.slane %v326_v41, 1  ;;  %v354_v46 = vrot.slane %v353_v42, 2 }
  0x3b   : > { %v342_v48 = vrot.slane %v341_v63, 1  ;;  %v348_v49 = vmax.f32 %v346_v39, %v347_v44  ;;  %v336_v54 = vmax.f32 %v334_v37, %v335_v43 }
  0x3c   : > { %v328_v51 = vmax.f32 %v326_v41, %v327_v0  ;;  %v391_v52 = vrot.slane %v321_v45, 6  ;;  %v355_v53 = vmax.f32 %v353_v42, %v354_v46 }
  0x3d   : > { %v343_v55 = vmax.f32 %v341_v63, %v342_v48  ;;  %v349_v56 = vrot.slane %v348_v49, 1 }
  0x3e   : > { %v392_v57 = vsel %vm378_vm5, %v391_v52, %v390_v47  ;;  %v393_v58 = vrot.slane %v328_v51, 5  ;;  %v356_v60 = vrot.slane %v355_v53, 1 }
  0x3f   : > { %v350_v61 = vmax.f32 %v348_v49, %v349_v56  ;;  %v395_v2 = vrot.slane %v343_v55, 7 }
  0x40   : > { %v394_v62 = vsel %vm381_vm6, %v393_v58, %v392_v57  ;;  %v357_v1 = vmax.f32 %v355_v53, %v356_v60 }
  0x41   : > { %407 = vst.msk [vmem:[%s594_s25 + $0x8] sm:$0xf] %vm242_vm1, %v394_v62  ;;  %v396_v3 = vsel %vm375_vm4, %v395_v2, %v336_v54  ;;  %v397_v4 = vrot.slane %v350_v61, 6 }
  0x42   : > { %v399_v5 = vrot.slane %v357_v1, 5 }
  0x43   : > { %v398_v6 = vsel %vm378_vm5, %v397_v4, %v396_v3 }
  0x44   : > { %v400_v7 = vsel %vm381_vm6, %v399_v5, %v398_v6 }
  0x45   : > { %408 = vst.msk [vmem:[%s594_s25 + $0xc] sm:$0xf] %vm242_vm1, %v400_v7 }
  0x46 PF: > { %s13_s12 = sadd.s32 1, %s512_s12  }
  0x47   : > { %p10_p4 = scmp.ge.s32.totalorder %s13_s12, 4  }
  0x49   :  { %12 = sbr.rel (!%p10_p4) target bundleno = 1 (0x1), region = 62 }

// kernel: convnet_forward.2
= control target key start
LH: loop header
LB: loop body
LE: loop exit
PB: predicated region body
PF: predicated region fallthrough
CT: control target
= control target key end

     0   :  { %s890_s15 = smov 0   ;;  %s892_s16 = smov 0   ;;  %s1021_s0 = inlined_call_operand.vmem [shape: bf16[2,8,8,147], index: 0, kind: input, shape index: {}]   ;;  %s1022_s1 = inlined_call_operand.vmem [shape: bf16[147,64], index: 1, kind: input, shape index: {}]   ;;  %s1023_s2 = inlined_call_operand.vmem [shape: bf16[2,8,8,64], index: 2, kind: output, shape index: {0}]   ;;  %s1024_s3 = inlined_call_operand.vmem [shape: f32[2,1,1,64], index: 3, kind: output, shape index: {1}]   ;;  %s1025_s4 = inlined_call_operand.vmem [shape: f32[2,1,1,64], index: 4, kind: output, shape index: {2}]  }
   0x1   :  { %s894_s17 = smov 0  }
   0x2 LB: > { %s27_s18 = sadd.s32 1, %s858_s16  ;;  %p707_p0 = scmp.ge.s32.totalorder %s862_s17, 1  ;;  %s862_s17 = sphi %s894_s17, %s15_s17   ;;  %s858_s16 = sphi %s892_s16, %s1027_s16   ;;  %s854_s15 = sphi %s890_s15, %s1026_s15  }
   0x3   : > { %p29_p1 = scmp.ge.s32.totalorder %s27_s18, 2  ;;  %p193_p2 = scmp.lt.s32.totalorder %s862_s17, 3 }
   0x5   : > { %s1029_s18 = smov (%p29_p1, %s27_s18), 0  ;;  %p194_p3 = pnand %p707_p0, %p193_p2 }
   0x6   : > { %p241_p4 = scmp.lt.s32.totalorder (!%p194_p3), %s854_s15, 1 }
   0x7   : > { %197 = sbr.rel (%p194_p3) target bundleno = 222 (0xde), region = 28 }
   0xc   : > { %v803_v0 = vld [vmem:[%s1022_s1 + $0x38] sm:$0xff]  ;;  %v300_v1 = vld [vmem:[%s1022_s1 + $0x48] sm:$0x3]  ;;  %vm407_vm0 = vcmask 1040384   ;;  %vm408_vm1 = vcmask 1041408   ;;  %v802_v3 = vld [vmem:[%s1022_s1 + $0x30] sm:$0xff] }
   0xd   : > { %v374_v2 = vunpack.c.l.b16 %v300_v1  ;;  %414 = vmatpush.bf16.msra.mxu0 %v803_v0  ;;  %805 = vmatpush.bf16.msra.mxu2 %v803_v0  ;;  %v864_v4 = vmov 65535   ;;  %s1031_s15 = smov (!%p241_p4, %s854_s15), 1  ;;  %v801_v9 = vld [vmem:[%s1022_s1 + $0x28] sm:$0xff]  ;;  %v804_v10 = vld [vmem:[%s1022_s1 + $0x40] sm:$0xff]  ;;  %vm394_vm2 = vcmask 154624   ;;  %v799_v18 = vld [vmem:[%s1022_s1 + $0x18] sm:$0xff] }
   0xe   : > { %v409_v5 = vsel %vm407_vm0, 4294967295, %v864_v4  ;;  %s786_s25 = sshll.u32 %s1031_s15, 6  ;;  %v800_v15 = vld [vmem:[%s1022_s1 + $0x20] sm:$0xff]  ;;  %v798_v19 = vld [vmem:[%s1022_s1 + $0x10] sm:$0xff]  ;;  %v797_v20 = vld [vmem:[%s1022_s1 + $0x8] sm:$0xff]  ;;  %s787_s21 = sshll.u32 %s1031_s15, 5 }
   0xf   : > { %v384_v6 = vpack.c.b16 %v374_v2, %v374_v2  ;;  %v410_v7 = vsel %vm408_vm1, %v409_v5, 0  ;;  %s926_s30 = scalar_lea.vmem %s1021_s0, %s786_s25  ;;  %v796_v24 = vld [vmem:[%s1022_s1] sm:$0xff]  ;;  %s970_s24 = scalar_lea.vmem %s1023_s2, %s787_s21  ;;  %vm480_vm3 = vcmask 519168   ;;  %vm489_vm4 = vcmask 523264  }
  0x10   : > { %v790_v11 = vld [vmem:[%s926_s30 + $0x14] sm:$0xf]  ;;  %v724_v12 = vld [vmem:[%s926_s30 + $0x18] sm:$0xf0]  ;;  %v788_v13 = vld [vmem:[%s926_s30 + $0x4] sm:$0xf]  ;;  %s266_s27 = scalar_lea.vmem %s1024_s3, %s1031_s15 }
  0x11   : > { %v412_v8 = vand.u32 %v410_v7, %v384_v6  ;;  %415 = vmatpush.bf16.msra.mxu0 %v802_v3  ;;  %806 = vmatpush.bf16.msra.mxu2 %v802_v3  ;;  %v727_v14 = vor.u32 %v790_v11, %v724_v12  ;;  %v716_v16 = vld [vmem:[%s926_s30 + $0x8] sm:$0xf0]  ;;  %v792_v21 = vld [vmem:[%s926_s30 + $0x24] sm:$0xf]  ;;  %v714_v25 = vld [vmem:[%s926_s30] sm:$0xf] }
  0x12   : > { %v719_v17 = vor.u32 %v788_v13, %v716_v16  ;;  %v732_v22 = vld [vmem:[%s926_s30 + $0x28] sm:$0xf0]  ;;  %v789_v26 = vld [vmem:[%s926_s30 + $0x4] sm:$0xf0]  ;;  %v730_v27 = vld [vmem:[%s926_s30 + $0x20] sm:$0xf] }
  0x13   : > { %813 = vmatpush.bf16.msra.mxu3 %v412_v8  ;;  %449 = vmatpush.bf16.msra.mxu1 %v412_v8  ;;  %v735_v23 = vor.u32 %v792_v21, %v732_v22  ;;  %v793_v28 = vld [vmem:[%s926_s30 + $0x24] sm:$0xf0]  ;;  %v715_v29 = vor.u32 %v789_v26, %v714_v25  ;;  %v794_v31 = vld [vmem:[%s926_s30 + $0x34] sm:$0xf]  ;;  %v740_v32 = vld [vmem:[%s926_s30 + $0x38] sm:$0xf0] }
  0x14   : > { %v731_v30 = vor.u32 %v793_v28, %v730_v27  ;;  %v743_v33 = vor.u32 %v794_v31, %v740_v32  ;;  %v722_v34 = vld [vmem:[%s926_s30 + $0x10] sm:$0xf]  ;;  %v791_v35 = vld [vmem:[%s926_s30 + $0x14] sm:$0xf0]  ;;  %vm511_vm5 = vcmask 516096  }
  0x15   : > { %416 = vmatpush.bf16.msra.mxu0 %v801_v9  ;;  %807 = vmatpush.bf16.msra.mxu2 %v801_v9  ;;  %v738_v36 = vld [vmem:[%s926_s30 + $0x30] sm:$0xf]  ;;  %v795_v37 = vld [vmem:[%s926_s30 + $0x34] sm:$0xf0]  ;;  %v723_v38 = vor.u32 %v791_v35, %v722_v34  ;;  %s272_s30 = scalar_lea.vmem %s1025_s4, %s1031_s15 }
  0x16   : > { %v739_v39 = vor.u32 %v795_v37, %v738_v36 }
  0x17   : > { %814 = vmatpush.bf16.msra.mxu3 %v804_v10  ;;  %450 = vmatpush.bf16.msra.mxu1 %v804_v10 }
  0x19   : > { %417 = vmatpush.bf16.msra.mxu0 %v800_v15  ;;  %808 = vmatpush.bf16.msra.mxu2 %v800_v15 }
  0x1a   : > { %781 = vmatmul.msk.bf16.vlgmr.msra.gmra.mxu3 %vm394_vm2, %v727_v14  ;;  %780 = vmatmul.msk.bf16.vlgmr.msra.gmra.mxu1 %vm394_vm2, %v719_v17 }
  0x1d   : > { %418 = vmatpush.bf16.msra.mxu0 %v799_v18  ;;  %809 = vmatpush.bf16.msra.mxu2 %v799_v18 }
  0x21   : > { %419 = vmatpush.bf16.msra.mxu0 %v798_v19  ;;  %810 = vmatpush.bf16.msra.mxu2 %v798_v19 }
  0x25   : > { %420 = vmatpush.bf16.msra.mxu0 %v797_v20  ;;  %811 = vmatpush.bf16.msra.mxu2 %v797_v20 }
  0x29   : > { %421 = vmatpush.bf16.msra.mxu0 %v796_v24  ;;  %812 = vmatpush.bf16.msra.mxu2 %v796_v24 }
  0x2a   : > { %782 = vmatmul.msk.bf16.gmra.mxu3 %vm394_vm2, %v735_v23 }
  0x2c   : > { %422 = vmatmul.bf16.vlgmr.msra.gmra.mxu0 %v715_v29  ;;  %432 = vmatmul.bf16.vlgmr.msra.gmra.mxu2 %v731_v30 }
  0x3a   : > { %783 = vmatmul.msk.bf16.gmra.mxu3 %vm394_vm2, %v743_v33 }
  0x3c   : > { %427 = vmatmul.bf16.gmra.mxu0 %v723_v38  ;;  %437 = vmatmul.bf16.gmra.mxu2 %v739_v39 }
  0x97   : > { %v452_v42 = vpop.f32.mrf.mxu1 }
  0x9d   : > { %v457_v40 = vpop.f32.mrf.mxu3 }
  0x9f   : > { %v454_v47 = vpop.f32.mrf.mxu1 }
  0xa5   : > { %v459_v41 = vpop.f32.mrf.mxu3 }
  0xa9   : > { %v423_v43 = vpop.f32.mrf.mxu0 }
  0xaa   : > { %v453_v44 = vadd.f32 %v452_v42, %v423_v43 }
  0xac   : > { %v472_v45 = vpack.c.bf16 %v453_v44, %v453_v44  ;;  %v513_v62 = vmul.f32 %v453_v44, %v453_v44  ;;  %v490_v2 = vsel %vm489_vm4, %v453_v44, 0.0 }
  0xad   : > { %v462_v46 = vpop.f32.mrf.mxu3 }
  0xae   : > { %481 = vst.msk [vmem:[%s970_s24] sm:$0xf] %vm480_vm3, %v472_v45  ;;  %v521_v9 = vsel %vm489_vm4, %v513_v62, 0.0 }
  0xaf   : > { %v433_v48 = vpop.f32.mrf.mxu2 }
  0xb0   : > { %v463_v49 = vadd.f32 %v462_v46, %v433_v48 }
  0xb1   : > { %v425_v50 = vpop.f32.mrf.mxu0 }
  0xb2   : > { %v455_v51 = vadd.f32 %v454_v47, %v425_v50  ;;  %v476_v52 = vpack.c.bf16 %v463_v49, %v463_v49  ;;  %v517_v15 = vmul.f32 %v463_v49, %v463_v49  ;;  %v497_v21 = vsel %vm489_vm4, %v463_v49, 0.0 }
  0xb4   : > { %v473_v53 = vpack.c.bf16 %v455_v51, %v455_v51  ;;  %485 = vst.msk [vmem:[%s970_s24 + $0x10] sm:$0xf] %vm480_vm3, %v476_v52  ;;  %v514_v60 = vmul.f32 %v455_v51, %v455_v51  ;;  %v491_v63 = vsel %vm489_vm4, %v455_v51, 0.0  ;;  %v528_v26 = vsel %vm489_vm4, %v517_v15, 0.0 }
  0xb5   : > { %v464_v54 = vpop.f32.mrf.mxu3  ;;  %v492_v6 = vadd.f32 %v491_v63, %v490_v2 }
  0xb6   : > { %482 = vst.msk [vmem:[%s970_s24 + $0x4] sm:$0xf] %vm480_vm3, %v473_v53  ;;  %v522_v3 = vsel %vm489_vm4, %v514_v60, 0.0 }
  0xb7   : > { %v435_v55 = vpop.f32.mrf.mxu2  ;;  %v523_v12 = vadd.f32 %v522_v3, %v521_v9 }
  0xb8   : > { %v465_v56 = vadd.f32 %v464_v54, %v435_v55 }
  0xb9   : > { %v428_v57 = vpop.f32.mrf.mxu0 }
  0xba   : > { %v458_v58 = vadd.f32 %v457_v40, %v428_v57  ;;  %v477_v59 = vpack.c.bf16 %v465_v56, %v465_v56  ;;  %v518_v23 = vmul.f32 %v465_v56, %v465_v56  ;;  %v499_v27 = vsel %vm489_vm4, %v465_v56, 0.0 }
  0xbc   : > { %v474_v61 = vpack.c.bf16 %v458_v58, %v458_v58  ;;  %486 = vst.msk [vmem:[%s970_s24 + $0x14] sm:$0xf] %vm480_vm3, %v477_v59  ;;  %v515_v0 = vmul.f32 %v458_v58, %v458_v58  ;;  %v493_v4 = vsel %vm489_vm4, %v458_v58, 0.0  ;;  %v530_v35 = vsel %vm489_vm4, %v518_v23, 0.0 }
  0xbd   : > { %v467_v1 = vpop.f32.mrf.mxu3  ;;  %v494_v13 = vadd.f32 %v493_v4, %v492_v6 }
  0xbe   : > { %483 = vst.msk [vmem:[%s970_s24 + $0x8] sm:$0xf] %vm480_vm3, %v474_v61  ;;  %v524_v10 = vsel %vm489_vm4, %v515_v0, 0.0 }
  0xbf   : > { %v438_v5 = vpop.f32.mrf.mxu2  ;;  %v525_v19 = vadd.f32 %v524_v10, %v523_v12 }
  0xc0   : > { %v468_v7 = vadd.f32 %v467_v1, %v438_v5 }
  0xc1   : > { %v430_v8 = vpop.f32.mrf.mxu0 }
  0xc2   : > { %v460_v11 = vadd.f32 %v459_v41, %v430_v8  ;;  %v478_v14 = vpack.c.bf16 %v468_v7, %v468_v7  ;;  %v519_v30 = vmul.f32 %v468_v7, %v468_v7  ;;  %v501_v34 = vsel %vm489_vm4, %v468_v7, 0.0 }
  0xc4   : > { %v475_v16 = vpack.c.bf16 %v460_v11, %v460_v11  ;;  %v495_v17 = vsel %vm489_vm4, %v460_v11, 0.0  ;;  %v516_v18 = vmul.f32 %v460_v11, %v460_v11  ;;  %487 = vst.msk [vmem:[%s970_s24 + $0x18] sm:$0xf] %vm480_vm3, %v478_v14  ;;  %v532_v41 = vsel %vm489_vm4, %v519_v30, 0.0 }
  0xc5   : > { %v496_v20 = vadd.f32 %v495_v17, %v494_v13  ;;  %v469_v28 = vpop.f32.mrf.mxu3 }
  0xc6   : > { %484 = vst.msk [vmem:[%s970_s24 + $0xc] sm:$0xf] %vm480_vm3, %v475_v16  ;;  %v526_v22 = vsel %vm489_vm4, %v516_v18, 0.0 }
  0xc7   : > { %v498_v24 = vadd.f32 %v497_v21, %v496_v20  ;;  %v527_v25 = vadd.f32 %v526_v22, %v525_v19  ;;  %v440_v29 = vpop.f32.mrf.mxu2 }
  0xc8   : > { %v470_v32 = vadd.f32 %v469_v28, %v440_v29 }
  0xc9   : > { %v529_v31 = vadd.f32 %v528_v26, %v527_v25  ;;  %v500_v33 = vadd.f32 %v499_v27, %v498_v24 }
  0xca   : > { %v479_v36 = vpack.c.bf16 %v470_v32, %v470_v32  ;;  %v520_v38 = vmul.f32 %v470_v32, %v470_v32  ;;  %v503_v39 = vsel %vm489_vm4, %v470_v32, 0.0 }
  0xcb   : > { %v502_v37 = vadd.f32 %v501_v34, %v500_v33  ;;  %v531_v40 = vadd.f32 %v530_v35, %v529_v31 }
  0xcc   : > { %488 = vst.msk [vmem:[%s970_s24 + $0x1c] sm:$0xf] %vm480_vm3, %v479_v36  ;;  %v534_v45 = vsel %vm489_vm4, %v520_v38, 0.0 }
  0xcd   : > { %v504_v42 = vadd.f32 %v503_v39, %v502_v37  ;;  %v533_v43 = vadd.f32 %v532_v41, %v531_v40 }
  0xcf   : > { %v505_v44 = vrot.slane %v504_v42, 4  ;;  %v535_v46 = vadd.f32 %v534_v45, %v533_v43 }
  0xd1   : > { %v506_v47 = vadd.f32 %v505_v44, %v504_v42  ;;  %v536_v48 = vrot.slane %v535_v46, 4 }
  0xd3   : > { %v507_v49 = vrot.slane %v506_v47, 2  ;;  %v537_v50 = vadd.f32 %v536_v48, %v535_v46 }
  0xd5   : > { %v508_v51 = vadd.f32 %v507_v49, %v506_v47  ;;  %v538_v52 = vrot.slane %v537_v50, 2 }
  0xd7   : > { %v509_v53 = vrot.slane %v508_v51, 1  ;;  %v539_v54 = vadd.f32 %v538_v52, %v537_v50 }
  0xd9   : > { %v510_v55 = vadd.f32 %v509_v53, %v508_v51  ;;  %v540_v56 = vrot.slane %v539_v54, 1 }
  0xdb   : > { %512 = vst.msk [vmem:[%s266_s27] sm:$0x1] %vm511_vm5, %v510_v55  ;;  %v541_v57 = vadd.f32 %v540_v56, %v539_v54 }
  0xdd   : > { %542 = vst.msk [vmem:[%s272_s30] sm:$0x1] %vm511_vm5, %v541_v57 }
  0xde PF: > { %s15_s17 = sadd.s32 1, %s862_s17   ;;  %s1026_s15 = smov %s858_s16 }
  0xdf   : > { %p12_p5 = scmp.ge.s32.totalorder %s15_s17, 4   ;;  %s1027_s16 = smov %s1029_s18 }
  0xe1   :  { %14 = sbr.rel (!%p12_p5) target bundleno = 2 (0x2), region = 82 }

</bundles_post_ra>
